<compile_context>
chip_gen: v5e
topology: v5e:2x2
jax: 0.10.0
libtpu: 0.0.40
codegen_flags: <defaults>
</compile_context>

<pallas_src>
import functools

import jax
import jax.numpy as jnp
from jax.experimental import pallas as pl
from jax.experimental.pallas import tpu as pltpu

NEG_SLOPE = 0.01      # torch.nn.LeakyReLU default
LANE = 128            # lane-dense padded width for all hidden / output dims
NEG_BIG = -1e9        # bias padding for fake classes -> softmax weight 0


def _leaky_relu(x):
    return jnp.where(x > 0, x, NEG_SLOPE * x)


def dqn_kernel(x_ref, wfe_ref, w1_ref, w2_ref, w3_ref, b_ref, out_ref,
               *, b_tile, seq):
    # x_ref: (b_tile*seq, D_in) -- rows of a batch-tile of samples, sample-major.
    # wfe_ref: (D_in, 128); w1/w2/w3_ref: (128, 128); b_ref: (4, 128) packed biases.

    # --- feature extraction: one big Linear + LeakyReLU over all rows ---
    feat = jnp.dot(x_ref[...], wfe_ref[...], preferred_element_type=jnp.float32)
    feat = _leaky_relu(feat + b_ref[0:1, :])                    # (b_tile*seq, 128)

    # --- torch.max(..., dim=0)[0] per sample -> (b_tile, 128) ---
    h = jnp.max(feat.reshape(b_tile, seq, LANE), axis=1)

    # --- MLP head: Linear -> LeakyReLU (Dropout identity in eval), twice ---
    # TODO(synk): Dropout is identity in eval mode; training-mode mask not implemented.
    h = _leaky_relu(
        jnp.dot(h, w1_ref[...], preferred_element_type=jnp.float32) + b_ref[1:2, :])
    h = _leaky_relu(
        jnp.dot(h, w2_ref[...], preferred_element_type=jnp.float32) + b_ref[2:3, :])

    # --- final Linear (padded classes get logit -1e9) + Softmax over classes ---
    logits = jnp.dot(h, w3_ref[...], preferred_element_type=jnp.float32) + b_ref[3:4, :]
    z = logits - jnp.max(logits, axis=-1, keepdims=True)
    e = jnp.exp(z)
    out_ref[...] = e * pl.reciprocal(jnp.sum(e, axis=-1, keepdims=True), approx=False)


def pad_params(params):
    """Zero-pad weights to 128 output lanes; pack biases into one (4, 128) array."""
    wfe, bfe, w1, b1, w2, b2, w3, b3 = params

    def pad_to(a, rows, cols, fill=0.0):
        r, c = a.shape
        return jnp.pad(a, ((0, rows - r), (0, cols - c)), constant_values=fill)

    wfe_p = pad_to(wfe, wfe.shape[0], LANE)    # (D_in, 128)
    w1_p = pad_to(w1, LANE, LANE)              # (128, 128)
    w2_p = pad_to(w2, LANE, LANE)              # (128, 128)
    w3_p = pad_to(w3, LANE, LANE)              # (128, 128)
    b_pack = jnp.concatenate(
        [
            pad_to(bfe, 1, LANE),              # zero-padded hidden biases
            pad_to(b1, 1, LANE),
            pad_to(b2, 1, LANE),
            pad_to(b3, 1, LANE, fill=NEG_BIG), # fake classes -> exp() == 0
        ],
        axis=0,
    )                                          # (4, 128)
    return wfe_p, w1_p, w2_p, w3_p, b_pack


def dqn_forward(x, padded_params, n_classes, *, b_tile=32):
    """x: (B, T, D_in) float32 batch of independent samples."""
    B, T, D_in = x.shape
    assert B % b_tile == 0, "batch must be a multiple of the batch tile"
    wfe_p, w1_p, w2_p, w3_p, b_pack = padded_params

    x2 = x.reshape(B * T, D_in)                # sample-major rows
    kernel = functools.partial(dqn_kernel, b_tile=b_tile, seq=T)

    out = pl.pallas_call(
        kernel,
        out_shape=jax.ShapeDtypeStruct((B, LANE), jnp.float32),
        grid_spec=pltpu.PrefetchScalarGridSpec(
            num_scalar_prefetch=0,
            grid=(B // b_tile,),
            in_specs=[
                # Batch-tiled activations: a new tile each grid step.
                pl.BlockSpec((b_tile * T, D_in), lambda b: (b, 0)),
                # Weights / packed biases: constant index_map -> DMA'd once,
                # VMEM-resident for the whole call.
                pl.BlockSpec(wfe_p.shape, lambda b: (0, 0)),
                pl.BlockSpec(w1_p.shape, lambda b: (0, 0)),
                pl.BlockSpec(w2_p.shape, lambda b: (0, 0)),
                pl.BlockSpec(w3_p.shape, lambda b: (0, 0)),
                pl.BlockSpec(b_pack.shape, lambda b: (0, 0)),
            ],
            out_specs=pl.BlockSpec((b_tile, LANE), lambda b: (b, 0)),
        ),
        compiler_params=pltpu.CompilerParams(
            dimension_semantics=("parallel",),  # shard batch over v7x's 2 TCs
        ),
    )(x2, wfe_p, w1_p, w2_p, w3_p, b_pack)

    return out[:, :n_classes]                  # drop lane padding outside kernel


def _ref_forward(x, params):
    """Pure-JAX reference on the unpadded parameters (per-sample semantics)."""
    wfe, bfe, w1, b1, w2, b2, w3, b3 = params
    feat = _leaky_relu(x @ wfe + bfe)          # (B, T, F)
    h = jnp.max(feat, axis=1)                  # (B, F)
    h = _leaky_relu(h @ w1 + b1)
    h = _leaky_relu(h @ w2 + b2)
    logits = h @ w3 + b3
    return jax.nn.softmax(logits, axis=-1)


def make_params(key, d_in, feat_dim, linear_sizes, n_classes):
    sizes = [(d_in, feat_dim)]
    prev = feat_dim
    for s in linear_sizes:
        sizes.append((prev, s))
        prev = s
    sizes.append((prev, n_classes))
    params = []
    for fan_in, fan_out in sizes:
        key, kw, kb = jax.random.split(key, 3)
        bound = 1.0 / jnp.sqrt(fan_in)
        w = jax.random.uniform(kw, (fan_in, fan_out), jnp.float32, -bound, bound)
        b = jax.random.uniform(kb, (1, fan_out), jnp.float32, -bound, bound)
        params.extend([w, b])
    return tuple(params)


if __name__ == "__main__":
    B, B_TILE = 256, 32          # batch of independent samples / grid tile
    T, D_IN = 8, 16              # per-sample input: (seq, features)
    FEAT = 32                    # feature_extraction_module.output_size
    LINEAR_SIZES = (64, 32)
    N_CLASSES = 10

    key = jax.random.PRNGKey(0)
    kx, kp = jax.random.split(key)
    x = jax.random.normal(kx, (B, T, D_IN), jnp.float32)
    params = make_params(kp, D_IN, FEAT, LINEAR_SIZES, N_CLASSES)
    padded = pad_params(params)

    out = jax.block_until_ready(dqn_forward(x, padded, N_CLASSES, b_tile=B_TILE))
    ref = jax.block_until_ready(_ref_forward(x, params))

    assert out.shape == (B, N_CLASSES)
    assert jnp.allclose(out, ref, atol=1e-5, rtol=1e-5)
    assert jnp.allclose(jnp.sum(out, axis=-1), 1.0, atol=1e-5)
    print("KERNEL_OK")
</pallas_src>

<mosaic_0001>
module attributes {stable_mosaic.version = 11 : i64} {
  func.func @dqn_kernel(%arg0: i32, %arg1: memref<256x16xf32, #tpu.memory_space<vmem>>, %arg2: memref<16x128xf32, #tpu.memory_space<vmem>>, %arg3: memref<128x128xf32, #tpu.memory_space<vmem>>, %arg4: memref<128x128xf32, #tpu.memory_space<vmem>>, %arg5: memref<128x128xf32, #tpu.memory_space<vmem>>, %arg6: memref<4x128xf32, #tpu.memory_space<vmem>>, %arg7: memref<32x128xf32, #tpu.memory_space<vmem>>) attributes {dimension_semantics = [#tpu.dimension_semantics<parallel>], iteration_bounds = array<i64: 8>, scalar_prefetch = 0 : i64, scratch_operands = 0 : i64, tpu.core_type = #tpu.core_type<tc>, window_params = [{transform_indices = @transform_0, window_bounds = array<i64: 256, 16>}, {pipeline_mode = #tpu.pipeline_mode<synchronous>, transform_indices = @transform_1, window_bounds = array<i64: 16, 128>}, {pipeline_mode = #tpu.pipeline_mode<synchronous>, transform_indices = @transform_2, window_bounds = array<i64: 128, 128>}, {pipeline_mode = #tpu.pipeline_mode<synchronous>, transform_indices = @transform_3, window_bounds = array<i64: 128, 128>}, {pipeline_mode = #tpu.pipeline_mode<synchronous>, transform_indices = @transform_4, window_bounds = array<i64: 128, 128>}, {pipeline_mode = #tpu.pipeline_mode<synchronous>, transform_indices = @transform_5, window_bounds = array<i64: 4, 128>}, {transform_indices = @transform_6, window_bounds = array<i64: 32, 128>}]} {
    %c0 = arith.constant 0 : index
    %c0_0 = arith.constant 0 : index
    %0 = vector.load %arg1[%c0, %c0_0] : memref<256x16xf32, #tpu.memory_space<vmem>>, vector<256x16xf32>
    %c0_1 = arith.constant 0 : index
    %c0_2 = arith.constant 0 : index
    %1 = vector.load %arg2[%c0_1, %c0_2] : memref<16x128xf32, #tpu.memory_space<vmem>>, vector<16x128xf32>
    %cst = arith.constant dense<0.000000e+00> : vector<256x128xf32>
    %2 = tpu.matmul %0, %1, %cst {dimension_numbers = #tpu.dot_dimension_numbers<[1], [0], [0], [1], [0, 0, 1, 1], [], []>} : vector<256x16xf32>, vector<16x128xf32>, vector<256x128xf32> -> vector<256x128xf32>
    %c0_3 = arith.constant 0 : index
    %c0_4 = arith.constant 0 : index
    %3 = vector.load %arg6[%c0_3, %c0_4] : memref<4x128xf32, #tpu.memory_space<vmem>>, vector<1x128xf32>
    %4 = vector.broadcast %3 : vector<1x128xf32> to vector<256x128xf32>
    %5 = arith.addf %2, %4 : vector<256x128xf32>
    %cst_5 = arith.constant 0.000000e+00 : f32
    %6 = vector.broadcast %cst_5 : f32 to vector<256x128xf32>
    %7 = arith.cmpf ogt, %5, %6 : vector<256x128xf32>
    %cst_6 = arith.constant 0.00999999977 : f32
    %8 = vector.broadcast %cst_6 : f32 to vector<256x128xf32>
    %9 = arith.mulf %8, %5 : vector<256x128xf32>
    %10 = arith.select %7, %5, %9 : vector<256x128xi1>, vector<256x128xf32>
    %11 = vector.shape_cast %10 : vector<256x128xf32> to vector<32x8x128xf32>
    %cst_7 = arith.constant dense<0xFF800000> : vector<32x128xf32>
    %12 = vector.multi_reduction <maximumf>, %11, %cst_7 [1] : vector<32x8x128xf32> to vector<32x128xf32>
    %c0_8 = arith.constant 0 : index
    %c0_9 = arith.constant 0 : index
    %13 = vector.load %arg3[%c0_8, %c0_9] : memref<128x128xf32, #tpu.memory_space<vmem>>, vector<128x128xf32>
    %cst_10 = arith.constant dense<0.000000e+00> : vector<32x128xf32>
    %14 = tpu.matmul %12, %13, %cst_10 {dimension_numbers = #tpu.dot_dimension_numbers<[1], [0], [0], [1], [0, 0, 1, 1], [], []>} : vector<32x128xf32>, vector<128x128xf32>, vector<32x128xf32> -> vector<32x128xf32>
    %c1 = arith.constant 1 : index
    %c0_11 = arith.constant 0 : index
    %15 = vector.load %arg6[%c1, %c0_11] : memref<4x128xf32, #tpu.memory_space<vmem>>, vector<1x128xf32>
    %16 = vector.broadcast %15 : vector<1x128xf32> to vector<32x128xf32>
    %17 = arith.addf %14, %16 : vector<32x128xf32>
    %cst_12 = arith.constant 0.000000e+00 : f32
    %18 = vector.broadcast %cst_12 : f32 to vector<32x128xf32>
    %19 = arith.cmpf ogt, %17, %18 : vector<32x128xf32>
    %cst_13 = arith.constant 0.00999999977 : f32
    %20 = vector.broadcast %cst_13 : f32 to vector<32x128xf32>
    %21 = arith.mulf %20, %17 : vector<32x128xf32>
    %22 = arith.select %19, %17, %21 : vector<32x128xi1>, vector<32x128xf32>
    %c0_14 = arith.constant 0 : index
    %c0_15 = arith.constant 0 : index
    %23 = vector.load %arg4[%c0_14, %c0_15] : memref<128x128xf32, #tpu.memory_space<vmem>>, vector<128x128xf32>
    %cst_16 = arith.constant dense<0.000000e+00> : vector<32x128xf32>
    %24 = tpu.matmul %22, %23, %cst_16 {dimension_numbers = #tpu.dot_dimension_numbers<[1], [0], [0], [1], [0, 0, 1, 1], [], []>} : vector<32x128xf32>, vector<128x128xf32>, vector<32x128xf32> -> vector<32x128xf32>
    %c2 = arith.constant 2 : index
    %c0_17 = arith.constant 0 : index
    %25 = vector.load %arg6[%c2, %c0_17] : memref<4x128xf32, #tpu.memory_space<vmem>>, vector<1x128xf32>
    %26 = vector.broadcast %25 : vector<1x128xf32> to vector<32x128xf32>
    %27 = arith.addf %24, %26 : vector<32x128xf32>
    %cst_18 = arith.constant 0.000000e+00 : f32
    %28 = vector.broadcast %cst_18 : f32 to vector<32x128xf32>
    %29 = arith.cmpf ogt, %27, %28 : vector<32x128xf32>
    %cst_19 = arith.constant 0.00999999977 : f32
    %30 = vector.broadcast %cst_19 : f32 to vector<32x128xf32>
    %31 = arith.mulf %30, %27 : vector<32x128xf32>
    %32 = arith.select %29, %27, %31 : vector<32x128xi1>, vector<32x128xf32>
    %c0_20 = arith.constant 0 : index
    %c0_21 = arith.constant 0 : index
    %33 = vector.load %arg5[%c0_20, %c0_21] : memref<128x128xf32, #tpu.memory_space<vmem>>, vector<128x128xf32>
    %cst_22 = arith.constant dense<0.000000e+00> : vector<32x128xf32>
    %34 = tpu.matmul %32, %33, %cst_22 {dimension_numbers = #tpu.dot_dimension_numbers<[1], [0], [0], [1], [0, 0, 1, 1], [], []>} : vector<32x128xf32>, vector<128x128xf32>, vector<32x128xf32> -> vector<32x128xf32>
    %c3 = arith.constant 3 : index
    %c0_23 = arith.constant 0 : index
    %35 = vector.load %arg6[%c3, %c0_23] : memref<4x128xf32, #tpu.memory_space<vmem>>, vector<1x128xf32>
    %36 = vector.broadcast %35 : vector<1x128xf32> to vector<32x128xf32>
    %37 = arith.addf %34, %36 : vector<32x128xf32>
    %cst_24 = arith.constant dense<0xFF800000> : vector<32xf32>
    %38 = vector.multi_reduction <maximumf>, %37, %cst_24 [1] : vector<32x128xf32> to vector<32xf32>
    %39 = vector.shape_cast %38 : vector<32xf32> to vector<32x1xf32>
    %40 = vector.broadcast %39 : vector<32x1xf32> to vector<32x128xf32>
    %41 = arith.subf %37, %40 : vector<32x128xf32>
    %42 = math.exp %41 : vector<32x128xf32>
    %cst_25 = arith.constant dense<0.000000e+00> : vector<32xf32>
    %43 = vector.multi_reduction <add>, %42, %cst_25 [1] : vector<32x128xf32> to vector<32xf32>
    %44 = vector.shape_cast %43 : vector<32xf32> to vector<32x1xf32>
    %45 = tpu.reciprocal %44 : vector<32x1xf32> -> vector<32x1xf32>
    %46 = vector.broadcast %45 : vector<32x1xf32> to vector<32x128xf32>
    %47 = arith.mulf %42, %46 : vector<32x128xf32>
    %c0_26 = arith.constant 0 : index
    %c0_27 = arith.constant 0 : index
    %48 = vector.load %arg7[%c0_26, %c0_27] : memref<32x128xf32, #tpu.memory_space<vmem>>, vector<32x128xf32>
    tpu.vector_store %arg7[%c0_26, %c0_27], %47 {strides = array<i32>} : memref<32x128xf32, #tpu.memory_space<vmem>>, vector<32x128xf32>,
    return
  }
  func.func @transform_0(%arg0: i32) -> (i32, i32) {
    %c0_i32 = arith.constant 0 : i32
    %c0_i32_0 = arith.constant 0 : i32
    return %arg0, %c0_i32 : i32, i32
  }
  func.func @transform_1(%arg0: i32) -> (i32, i32) {
    %c0_i32 = arith.constant 0 : i32
    %c0_i32_0 = arith.constant 0 : i32
    %c0_i32_1 = arith.constant 0 : i32
    return %c0_i32, %c0_i32_0 : i32, i32
  }
  func.func @transform_2(%arg0: i32) -> (i32, i32) {
    %c0_i32 = arith.constant 0 : i32
    %c0_i32_0 = arith.constant 0 : i32
    %c0_i32_1 = arith.constant 0 : i32
    return %c0_i32, %c0_i32_0 : i32, i32
  }
  func.func @transform_3(%arg0: i32) -> (i32, i32) {
    %c0_i32 = arith.constant 0 : i32
    %c0_i32_0 = arith.constant 0 : i32
    %c0_i32_1 = arith.constant 0 : i32
    return %c0_i32, %c0_i32_0 : i32, i32
  }
  func.func @transform_4(%arg0: i32) -> (i32, i32) {
    %c0_i32 = arith.constant 0 : i32
    %c0_i32_0 = arith.constant 0 : i32
    %c0_i32_1 = arith.constant 0 : i32
    return %c0_i32, %c0_i32_0 : i32, i32
  }
  func.func @transform_5(%arg0: i32) -> (i32, i32) {
    %c0_i32 = arith.constant 0 : i32
    %c0_i32_0 = arith.constant 0 : i32
    %c0_i32_1 = arith.constant 0 : i32
    return %c0_i32, %c0_i32_0 : i32, i32
  }
  func.func @transform_6(%arg0: i32) -> (i32, i32) {
    %c0_i32 = arith.constant 0 : i32
    %c0_i32_0 = arith.constant 0 : i32
    return %arg0, %c0_i32 : i32, i32
  }
}

</mosaic_0001>

<bundles_post_ra>
// kernel: tpu_custom_call.1
= control target key start
LH: loop header
LB: loop body
LE: loop exit
PB: predicated region body
PF: predicated region fallthrough
CT: control target
= control target key end

     0   :  { %11 = vsyncpa [#allocation3], 0  ;;  %s1880_s0 = inlined_call_operand.vmem [shape: f32[2048,16], index: 0, kind: input, shape index: {}]   ;;  %s1881_s1 = inlined_call_operand.vmem [shape: f32[16,128], index: 1, kind: input, shape index: {}]   ;;  %s1882_s2 = inlined_call_operand.vmem [shape: f32[128,128], index: 2, kind: input, shape index: {}]   ;;  %s1883_s3 = inlined_call_operand.vmem [shape: f32[128,128], index: 3, kind: input, shape index: {}]   ;;  %s1884_s4 = inlined_call_operand.vmem [shape: f32[128,128], index: 4, kind: input, shape index: {}]   ;;  %s1885_s5 = inlined_call_operand.vmem [shape: f32[4,128], index: 5, kind: input, shape index: {}]   ;;  %s1886_s6 = inlined_call_operand.hbm [shape: f32[256,128], index: 6, kind: output, shape index: {}]  }
   0x1   :  { %13 = vsyncpa [#allocation3 + $0x1], 0  ;;  %s1406_s21 = smov 0   ;;  %s1408_s22 = smov 0  }
   0x2   :  { %s1410_s23 = smov 0   ;;  %s1412_s24 = smov 0  }
   0x3 LB: > { %s1192_s25 = sadd.s32 4294967295, %s1367_s24   ;;  %s1193_s26 = sadd.s32 4294967294, %s1367_s24   ;;  %s1367_s24 = sphi %s1412_s24, %s1892_s24   ;;  %s1363_s23 = sphi %s1410_s23, %s1891_s23   ;;  %s1359_s22 = sphi %s1408_s22, %s1890_s22   ;;  %s1355_s21 = sphi %s1406_s21, %s1889_s21  }
   0x4   : > { %s1429_s27 = sadd.s32 1, %s1367_s24   ;;  %s157_s28 = sadd.s32 1, %s1363_s23 }
   0x5   : > { %s154_s29 = ssub.s32 %s1367_s24, %s1429_s27  ;;  %p167_p0 = scmp.ne.s32.totalorder %s1363_s23, %s1359_s22 }
   0x6   : > { %p155_p1 = scmp.eq.s32.totalorder %s154_s29, 0  ;;  %p168_p2 = scmp.eq.s32.totalorder %s1192_s25, 7 }
   0x7   : > { %p173_p3 = scmp.ne.s32.totalorder %s1359_s22, %s1355_s21  ;;  %p174_p4 = scmp.eq.s32.totalorder %s1193_s26, 7 }
   0x8   : > { %s1439_s30 = scalar_select %p155_p1, %s1363_s23, %s157_s28  }
   0x9   : > { %p1441_p5 = por %p168_p2, %p167_p0  ;;  %p1445_p6 = por %p174_p4, %p173_p3 }
   0xa   : > { %p1196_p7 = scmp.ge.s32.totalorder %s1367_s24, 1  ;;  %p216_p8 = scmp.lt.s32.totalorder %s1367_s24, 9 }
   0xc   : > { %p217_p9 = pnand %p1196_p7, %p216_p8 }
   0xd   : > { %s1457_s13 = sshll.u32 (!%p217_p9), %s1192_s25, 5 }
   0xe   : > { %220 = sbr.rel (%p217_p9) target bundleno = 951 (0x3b7), region = 44  ;;  %p247_p10 = scmp.lt.s32.totalorder (!%p217_p9), %s1457_s13, 255 }
   0xf   : > { %s1127_s28 = scalar_lea.hbm (!%p217_p9), %s1886_s6, %s1457_s13 }
  0x10   : > { %s1846_s9 = sshll.u32 (!%p217_p9), %s1127_s28, 4  ;;  %s1131_s9 = int_to_ptr.hbm [resolvable:$true] %s1846_s9 }
  0x11   : > { %s1319_s10 = sshra.s32 (!%p217_p9), %s1131_s9, 4  ;;  %s1320_s10 = int_to_ptr.hbm [resolvable:$true] %s1319_s10 }
  0x12   : > { %s1321_s11 = scalar_lea.hbm (!%p217_p9), %s1320_s10, 32  ;;  %p1326_p0 = scmp.lt.s32.totalorder (!%p217_p9), %s1320_s10, %s1886_s6 }
  0x13   : > { %v286_v0 = vld [vmem:[%s1881_s1 + $0x8] sm:$0xff]  ;;  %v285_v1 = vld [vmem:[%s1881_s1] sm:$0xff]  ;;  %s248_s14 = scalar_select %p247_p10, %s1457_s13, 255  ;;  %vm289_vm0 = vcmask 130048   ;;  %v802_v37 = vld [vmem:[%s1882_s2 + $0x78] sm:$0xff]  ;;  %vm837_vm14 = vcmask 1041409  }
  0x14   : > { %400 = vmatpush.msra.mxu0 %v286_v0  ;;  %1238 = vmatpush.msra.mxu1 %v286_v0  ;;  %v801_v38 = vld [vmem:[%s1882_s2 + $0x70] sm:$0xff]  ;;  %v800_v39 = vld [vmem:[%s1882_s2 + $0x68] sm:$0xff]  ;;  %v1542_v41 = vld [vmem:[%s1885_s5] ss:$0 sm:$0xff]  ;;  %p1322_p11 = scmp.ne.s32.totalorder %s1320_s10, %s1321_s11 }
  0x15   : > { %1240 = vmatpush.msra.mxu3 %v286_v0  ;;  %1239 = vmatpush.msra.mxu2 %v286_v0  ;;  %s1199_s15 = sshll.u32 %s248_s14, 3  ;;  %v799_v42 = vld [vmem:[%s1882_s2 + $0x60] sm:$0xff]  ;;  %v798_v44 = vld [vmem:[%s1882_s2 + $0x58] sm:$0xff]  ;;  %v797_v47 = vld [vmem:[%s1882_s2 + $0x50] sm:$0xff] }
  0x16   : > { %401 = vmatpush.msra.mxu0 %v285_v1  ;;  %1241 = vmatpush.msra.mxu1 %v285_v1  ;;  %s1464_s18 = scalar_lea.vmem %s1880_s0, %s1199_s15  ;;  %v796_v48 = vld [vmem:[%s1882_s2 + $0x48] sm:$0xff]  ;;  %v795_v52 = vld [vmem:[%s1882_s2 + $0x40] sm:$0xff]  ;;  %v794_v54 = vld [vmem:[%s1882_s2 + $0x38] sm:$0xff]  ;;  %p1323_p12 = pnand %p1322_p11, %p1441_p5 }
  0x17   : > { %1243 = vmatpush.msra.mxu3 %v285_v1  ;;  %1242 = vmatpush.msra.mxu2 %v285_v1  ;;  %v253_v2 = vld [vmem:[%s1464_s18] sm:$0xff]  ;;  %v266_v3 = vld [vmem:[%s1464_s18 + $0x68] sm:$0xff]  ;;  %v267_v7 = vld [vmem:[%s1464_s18 + $0x70] sm:$0xff]  ;;  %s1325_s15 = scalar_lea.hbm %s1886_s6, 256 }
  0x18   : > { %1200 = vmatmul.msk.f32.vlgmr.msra.gmra.mxu0 %vm289_vm0, %v253_v2  ;;  %1213 = vmatmul.msk.f32.vlgmr.msra.gmra.mxu1 %vm289_vm0, %v266_v3  ;;  %v278_v4 = vld [vmem:[%s1464_s18 + $0xc8] sm:$0xff]  ;;  %v279_v8 = vld [vmem:[%s1464_s18 + $0xd0] sm:$0xff]  ;;  %v268_v11 = vld [vmem:[%s1464_s18 + $0x78] sm:$0xff]  ;;  %p1324_p13 = pneg %p1323_p12  ;;  %p1327_p1 = scmp.lt.s32.totalorder %s1325_s15, %s1321_s11 }
  0x19   : > { %1225 = vmatmul.msk.f32.vlgmr.msra.gmra.mxu3 %vm289_vm0, %v278_v4  ;;  %v274_v5 = vld [vmem:[%s1464_s18 + $0xa8] sm:$0xff]  ;;  %v275_v9 = vld [vmem:[%s1464_s18 + $0xb0] sm:$0xff]  ;;  %v280_v12 = vld [vmem:[%s1464_s18 + $0xd8] sm:$0xff]  ;;  %876 = vmatpush.msrb.mxu1 %v802_v37 }
  0x1a   : > { %1221 = vmatmul.msk.f32.vlgmr.msra.gmra.mxu2 %vm289_vm0, %v274_v5  ;;  %v254_v6 = vld [vmem:[%s1464_s18 + $0x8] sm:$0xff]  ;;  %v255_v10 = vld [vmem:[%s1464_s18 + $0x10] sm:$0xff]  ;;  %v276_v13 = vld [vmem:[%s1464_s18 + $0xb8] sm:$0xff]  ;;  %p1328_p2 = por %p1327_p1, %p1326_p0 }
  0x1b   : > { %v256_v14 = vld [vmem:[%s1464_s18 + $0x18] sm:$0xff]  ;;  %v269_v15 = vld [vmem:[%s1464_s18 + $0x80] sm:$0xff]  ;;  %v270_v19 = vld [vmem:[%s1464_s18 + $0x88] sm:$0xff]  ;;  %877 = vmatpush.msrb.mxu1 %v801_v38 }
  0x1c   : > { %v281_v16 = vld [vmem:[%s1464_s18 + $0xe0] sm:$0xff]  ;;  %v282_v20 = vld [vmem:[%s1464_s18 + $0xe8] sm:$0xff]  ;;  %v271_v22 = vld [vmem:[%s1464_s18 + $0x90] sm:$0xff]  ;;  %p1329_p3 = pnand %p1328_p2, %p1324_p13 }
  0x1d   : > { %v277_v17 = vld [vmem:[%s1464_s18 + $0xc0] sm:$0xff]  ;;  %v258_v21 = vld [vmem:[%s1464_s18 + $0x28] sm:$0xff]  ;;  %v283_v23 = vld [vmem:[%s1464_s18 + $0xf0] sm:$0xff]  ;;  %878 = vmatpush.msrb.mxu1 %v800_v39 }
  0x1e   : > { %v257_v18 = vld [vmem:[%s1464_s18 + $0x20] sm:$0xff]  ;;  %v259_v24 = vld [vmem:[%s1464_s18 + $0x30] sm:$0xff]  ;;  %v272_v25 = vld [vmem:[%s1464_s18 + $0x98] sm:$0xff] }
  0x1f   : > { %v284_v26 = vld [vmem:[%s1464_s18 + $0xf8] sm:$0xff]  ;;  %v273_v28 = vld [vmem:[%s1464_s18 + $0xa0] sm:$0xff]  ;;  %v262_v30 = vld [vmem:[%s1464_s18 + $0x48] sm:$0xff]  ;;  %879 = vmatpush.msrb.mxu1 %v799_v42 }
  0x20   : > { %1201 = vmatmul.msk.f32.gmra.mxu0 %vm289_vm0, %v254_v6  ;;  %1214 = vmatmul.msk.f32.gmra.mxu1 %vm289_vm0, %v267_v7  ;;  %v260_v27 = vld [vmem:[%s1464_s18 + $0x38] sm:$0xff]  ;;  %v261_v29 = vld [vmem:[%s1464_s18 + $0x40] sm:$0xff]  ;;  %v263_v31 = vld [vmem:[%s1464_s18 + $0x50] sm:$0xff] }
  0x21   : > { %1226 = vmatmul.msk.f32.gmra.mxu3 %vm289_vm0, %v279_v8  ;;  %v264_v32 = vld [vmem:[%s1464_s18 + $0x58] sm:$0xff]  ;;  %v265_v33 = vld [vmem:[%s1464_s18 + $0x60] sm:$0xff]  ;;  %880 = vmatpush.msrb.mxu1 %v798_v44  ;;  %v793_v59 = vld [vmem:[%s1882_s2 + $0x30] sm:$0xff]  ;;  %s243_s18 = sand.u32 1, %s1359_s22  }
  0x22   : > { %1222 = vmatmul.msk.f32.gmra.mxu2 %vm289_vm0, %v275_v9  ;;  %v792_v61 = vld [vmem:[%s1882_s2 + $0x28] sm:$0xff]  ;;  %v791_v1 = vld [vmem:[%s1882_s2 + $0x20] sm:$0xff]  ;;  %v790_v5 = vld [vmem:[%s1882_s2 + $0x18] sm:$0xff]  ;;  %s1197_s19 = sshll.u32 %s243_s18, 5  ;;  %s1116_s13 = scalar_lea.sflag [#allocation3], %s243_s18 }
  0x23   : > { %881 = vmatpush.msrb.mxu1 %v797_v47  ;;  %s1835_s20 = scalar_lea.vmem [#allocation2], %s1197_s19 }
  0x24   : > { %s1128_s29 = sshll.u32 %s1835_s20, 4  ;;  %s1129_s29 = int_to_ptr.vmem [resolvable:$true] %s1128_s29 }
  0x25   : > { %882 = vmatpush.msrb.mxu1 %v796_v48 }
  0x27   : > { %883 = vmatpush.msrb.mxu1 %v795_v52 }
  0x28   : > { %1202 = vmatmul.msk.f32.gmra.mxu0 %vm289_vm0, %v255_v10  ;;  %1215 = vmatmul.msk.f32.gmra.mxu1 %vm289_vm0, %v268_v11  ;;  %v789_v11 = vld [vmem:[%s1882_s2 + $0x10] sm:$0xff] }
  0x29   : > { %1227 = vmatmul.msk.f32.gmra.mxu3 %vm289_vm0, %v280_v12  ;;  %884 = vmatpush.msrb.mxu1 %v794_v54 }
  0x2a   : > { %1223 = vmatmul.msk.f32.gmra.mxu2 %vm289_vm0, %v276_v13 }
  0x2b   : > { %885 = vmatpush.msrb.mxu1 %v793_v59 }
  0x2d   : > { %886 = vmatpush.msrb.mxu1 %v792_v61 }
  0x2f   : > { %887 = vmatpush.msrb.mxu1 %v791_v1 }
  0x30   : > { %1203 = vmatmul.msk.f32.gmra.mxu0 %vm289_vm0, %v256_v14  ;;  %1216 = vmatmul.msk.f32.gmra.mxu1 %vm289_vm0, %v269_v15 }
  0x31   : > { %1228 = vmatmul.msk.f32.gmra.mxu3 %vm289_vm0, %v281_v16  ;;  %888 = vmatpush.msrb.mxu1 %v790_v5 }
  0x32   : > { %1224 = vmatmul.msk.f32.gmra.mxu2 %vm289_vm0, %v277_v17 }
  0x33   : > { %889 = vmatpush.msrb.mxu1 %v789_v11 }
  0x38   : > { %1204 = vmatmul.msk.f32.gmra.mxu0 %vm289_vm0, %v257_v18  ;;  %1217 = vmatmul.msk.f32.gmra.mxu1 %vm289_vm0, %v270_v19  ;;  %v788_v18 = vld [vmem:[%s1882_s2 + $0x8] sm:$0xff] }
  0x39   : > { %1229 = vmatmul.msk.f32.gmra.mxu3 %vm289_vm0, %v282_v20  ;;  %890 = vmatpush.msrb.mxu1 %v788_v18 }
  0x40   : > { %1205 = vmatmul.msk.f32.gmra.mxu0 %vm289_vm0, %v258_v21  ;;  %1218 = vmatmul.msk.f32.gmra.mxu1 %vm289_vm0, %v271_v22 }
  0x41   : > { %1230 = vmatmul.msk.f32.gmra.mxu3 %vm289_vm0, %v283_v23 }
  0x48   : > { %1206 = vmatmul.msk.f32.gmra.mxu0 %vm289_vm0, %v259_v24  ;;  %1219 = vmatmul.msk.f32.gmra.mxu1 %vm289_vm0, %v272_v25 }
  0x49   : > { %1231 = vmatmul.msk.f32.gmra.mxu3 %vm289_vm0, %v284_v26  ;;  %v787_v26 = vld [vmem:[%s1882_s2] sm:$0xff] }
  0x4a   : > { %891 = vmatpush.msrb.mxu1 %v787_v26 }
  0x50   : > { %1207 = vmatmul.msk.f32.gmra.mxu0 %vm289_vm0, %v260_v27  ;;  %1220 = vmatmul.msk.f32.gmra.mxu1 %vm289_vm0, %v273_v28 }
  0x58   : > { %1208 = vmatmul.msk.f32.gmra.mxu0 %vm289_vm0, %v261_v29 }
  0x60   : > { %1209 = vmatmul.msk.f32.gmra.mxu0 %vm289_vm0, %v262_v30 }
  0x68   : > { %1210 = vmatmul.msk.f32.gmra.mxu0 %vm289_vm0, %v263_v31 }
  0x70   : > { %1211 = vmatmul.msk.f32.gmra.mxu0 %vm289_vm0, %v264_v32 }
  0x78   : > { %1212 = vmatmul.msk.f32.gmra.mxu0 %vm289_vm0, %v265_v33 }
  0x95   : > { %v403_v34 = vpop.f32.mrf.mxu0  ;;  %v442_v36 = vpop.f32.mrf.mxu1 }
  0x96   : > { %v404_v45 = vadd.f32 %v1542_v41, %v403_v34  ;;  %v443_v46 = vadd.f32 %v1542_v41, %v442_v36 }
  0x98   : > { %v531_v50 = vmul.f32 0.01, %v404_v45  ;;  %v544_v51 = vmul.f32 0.01, %v443_v46  ;;  %vm499_vm1 = vcmp.gt.f32.partialorder %v404_v45, 0.0  ;;  %vm512_vm2 = vcmp.gt.f32.partialorder %v443_v46, 0.0 }
  0x9a   : > { %v563_v57 = vsel %vm499_vm1, %v404_v45, %v531_v50  ;;  %v576_v58 = vsel %vm512_vm2, %v443_v46, %v544_v51  ;;  %vm839_vm2 = vcmask 1042434  }
  0x9b   : > { %v595_v62 = vrot.slane %v563_v57, 4  ;;  %v673_v63 = vrot.slane %v576_v58, 4 }
  0x9c   : > { %v478_v55 = vpop.f32.mrf.mxu3 }
  0x9d   : > { %v406_v35 = vpop.f32.mrf.mxu0  ;;  %v445_v43 = vpop.f32.mrf.mxu1  ;;  %v479_v2 = vadd.f32 %v1542_v41, %v478_v55  ;;  %v596_v6 = vmax.f32 %v563_v57, %v595_v62  ;;  %v674_v7 = vmax.f32 %v576_v58, %v673_v63 }
  0x9e   : > { %v407_v53 = vadd.f32 %v1542_v41, %v406_v35  ;;  %v446_v9 = vadd.f32 %v1542_v41, %v445_v43  ;;  %v466_v44 = vpop.f32.mrf.mxu2 }
  0x9f   : > { %v556_v13 = vmul.f32 0.01, %v479_v2  ;;  %vm524_vm4 = vcmp.gt.f32.partialorder %v479_v2, 0.0  ;;  %v597_v19 = vrot.slane %v596_v6, 2  ;;  %v675_v20 = vrot.slane %v674_v7, 2 }
  0xa0   : > { %v532_v60 = vmul.f32 0.01, %v407_v53  ;;  %vm500_vm3 = vcmp.gt.f32.partialorder %v407_v53, 0.0  ;;  %v545_v23 = vmul.f32 0.01, %v446_v9  ;;  %vm513_vm7 = vcmp.gt.f32.partialorder %v446_v9, 0.0 }
  0xa1   : > { %v588_v28 = vsel %vm524_vm4, %v479_v2, %v556_v13  ;;  %v598_v32 = vmax.f32 %v596_v6, %v597_v19  ;;  %v1596_v33 = vmax.f32 %v674_v7, %v675_v20  ;;  %vm841_vm4 = vcmask 1043459  }
  0xa2   : > { %v564_v3 = vsel %vm500_vm3, %v407_v53, %v532_v60  ;;  %v745_v35 = vrot.slane %v588_v28, 4  ;;  %v577_v36 = vsel %vm513_vm7, %v446_v9, %v545_v23  ;;  %v467_v60 = vadd.f32 %v1542_v41, %v466_v44 }
  0xa3   : > { %v601_v12 = vrot.slane %v564_v3, 4  ;;  %v599_v45 = vrot.slane %v598_v32, 1  ;;  %v677_v46 = vrot.slane %v1596_v33, 1  ;;  %v679_v47 = vrot.slane %v577_v36, 4 }
  0xa4   : > { %v481_v14 = vpop.f32.mrf.mxu3  ;;  %v746_v51 = vmax.f32 %v588_v28, %v745_v35  ;;  %vm520_vm13 = vcmp.gt.f32.partialorder %v467_v60, 0.0  ;;  %vm847_vm7 = vcmask 1046534  }
  0xa5   : > { %v409_v40 = vpop.f32.mrf.mxu0  ;;  %v1565_v56 = vpop.f32.mrf.mxu1  ;;  %v482_v17 = vadd.f32 %v1542_v41, %v481_v14  ;;  %v602_v27 = vmax.f32 %v564_v3, %v601_v12  ;;  %v680_v1 = vmax.f32 %v577_v36, %v679_v47 }
  0xa6   : > { %v410_v4 = vadd.f32 %v1542_v41, %v409_v40  ;;  %v449_v52 = vadd.f32 %v1542_v41, %v1565_v56  ;;  %v747_v3 = vrot.slane %v746_v51, 2  ;;  %v1610_v19 = vpop.f32.mrf.mxu2 }
  0xa7   : > { %v557_v30 = vmul.f32 0.01, %v482_v17  ;;  %vm525_vm10 = vcmp.gt.f32.partialorder %v482_v17, 0.0  ;;  %v603_v38 = vrot.slane %v602_v27, 2 }
  0xa8   : > { %v533_v16 = vmul.f32 0.01, %v410_v4  ;;  %vm501_vm5 = vcmp.gt.f32.partialorder %v410_v4, 0.0  ;;  %vm514_vm12 = vcmp.gt.f32.partialorder %v449_v52, 0.0 }
  0xa9   : > { %v589_v43 = vsel %vm525_vm10, %v482_v17, %v557_v30  ;;  %v604_v55 = vmax.f32 %v602_v27, %v603_v38  ;;  %v681_v30 = vrot.slane %v680_v1, 2 }
  0xaa   : > { %v565_v29 = vsel %vm501_vm5, %v410_v4, %v533_v16  ;;  %v751_v58 = vrot.slane %v589_v43, 4  ;;  %vm843_vm5 = vcmask 1044484  }
  0xab   : > { %v607_v39 = vrot.slane %v565_v29, 4 }
  0xac   : > { %v484_v59 = vpop.f32.mrf.mxu3  ;;  %v752_v7 = vmax.f32 %v589_v43, %v751_v58  ;;  %v1622_v58 = vmax.f32 %v680_v1, %v681_v30 }
  0xad   : > { %v412_v49 = vpop.f32.mrf.mxu0  ;;  %v451_v15 = vpop.f32.mrf.mxu1  ;;  %v608_v57 = vmax.f32 %v565_v29, %v607_v39  ;;  %v485_v62 = vadd.f32 %v1542_v41, %v484_v59  ;;  %v1616_v29 = vmax.f32 %v746_v51, %v747_v3 }
  0xae   : > { %v413_v8 = vadd.f32 %v1542_v41, %v412_v49  ;;  %v452_v56 = vadd.f32 %v1542_v41, %v451_v15  ;;  %v552_v15 = vmul.f32 0.01, %v467_v60 }
  0xaf   : > { %v609_v6 = vrot.slane %v608_v57, 2  ;;  %v558_v12 = vmul.f32 0.01, %v485_v62  ;;  %vm526_vm15 = vcmp.gt.f32.partialorder %v485_v62, 0.0 }
  0xb0   : > { %v534_v21 = vmul.f32 0.01, %v413_v8  ;;  %vm502_vm6 = vcmp.gt.f32.partialorder %v413_v8, 0.0  ;;  %v547_v14 = vmul.f32 0.01, %v452_v56  ;;  %vm515_vm0 = vcmp.gt.f32.partialorder %v452_v56, 0.0 }
  0xb1   : > { %v590_v27 = vsel %vm526_vm15, %v485_v62, %v558_v12  ;;  %v584_v35 = vsel %vm520_vm13, %v467_v60, %v552_v15 }
  0xb2   : > { %v566_v34 = vsel %vm502_vm6, %v413_v8, %v534_v21  ;;  %v546_v8 = vmul.f32 0.01, %v449_v52  ;;  %v610_v21 = vmax.f32 %v608_v57, %v609_v6  ;;  %v757_v39 = vrot.slane %v590_v27, 4 }
  0xb3   : > { %v613_v42 = vrot.slane %v566_v34, 4  ;;  %v721_v51 = vrot.slane %v584_v35, 4  ;;  %v749_v57 = vrot.slane %v1616_v29, 1  ;;  %vm845_vm6 = vcmask 1045509  }
  0xb4   : > { %v578_v23 = vsel %vm514_vm12, %v449_v52, %v546_v8  ;;  %v611_v38 = vrot.slane %v610_v21, 1  ;;  %v758_v62 = vmax.f32 %v590_v27, %v757_v39 }
  0xb5   : > { %v415_v0 = vpop.f32.mrf.mxu0  ;;  %v1600_v49 = vpop.f32.mrf.mxu1  ;;  %v614_v61 = vmax.f32 %v566_v34, %v613_v42  ;;  %v685_v34 = vrot.slane %v578_v23, 4 }
  0xb6   : > { %v416_v10 = vadd.f32 %v1542_v41, %v415_v0  ;;  %v1607_v0 = vmax.f32 %v598_v32, %v599_v45  ;;  %v579_v32 = vsel %vm515_vm0, %v452_v56, %v547_v14  ;;  %v759_v12 = vrot.slane %v758_v62, 2 }
  0xb7   : > { %v615_v11 = vrot.slane %v614_v61, 2  ;;  %v691_v47 = vrot.slane %v579_v32, 4  ;;  %v1624_v59 = vmax.f32 %v578_v23, %v685_v34  ;;  %v1645_v34 = vmax.f32 %v1616_v29, %v749_v57 }
  0xb8   : > { %v535_v24 = vmul.f32 0.01, %v416_v10  ;;  %vm503_vm8 = vcmp.gt.f32.partialorder %v416_v10, 0.0  ;;  %v1641_v30 = vmax.f32 %v758_v62, %v759_v12 }
  0xb9   : > { %v616_v26 = vmax.f32 %v614_v61, %v615_v11  ;;  %v612_v61 = vmax.f32 %v610_v21, %v611_v38  ;;  %v455_v11 = vadd.f32 %v1542_v41, %v1600_v49 }
  0xba   : > { %v567_v37 = vsel %vm503_vm8, %v416_v10, %v535_v24  ;;  %v605_v10 = vrot.slane %v604_v55, 1 }
  0xbb   : > { %v619_v48 = vrot.slane %v567_v37, 4  ;;  %v617_v44 = vrot.slane %v616_v26, 1  ;;  %v548_v23 = vmul.f32 0.01, %v455_v11  ;;  %vm516_vm8 = vcmp.gt.f32.partialorder %v455_v11, 0.0 }
  0xbc   : > { %v606_v43 = vmax.f32 %v604_v55, %v605_v10 }
  0xbd   : > { %v418_v22 = vpop.f32.mrf.mxu0  ;;  %v620_v2 = vmax.f32 %v567_v37, %v619_v48  ;;  %v487_v48 = vpop.f32.mrf.mxu3  ;;  %v618_v56 = vmax.f32 %v616_v26, %v617_v44 }
  0xbe   : > { %v419_v25 = vadd.f32 %v1542_v41, %v418_v22  ;;  %v753_v22 = vrot.slane %v752_v7, 2  ;;  %v488_v52 = vadd.f32 %v1542_v41, %v487_v48  ;;  %v761_v48 = vrot.slane %v1641_v30, 1 }
  0xbf   : > { %v621_v13 = vrot.slane %v620_v2, 2 }
  0xc0   : > { %vm504_vm9 = vcmp.gt.f32.partialorder %v419_v25, 0.0  ;;  %v536_v31 = vmul.f32 0.01, %v419_v25  ;;  %v754_v45 = vmax.f32 %v752_v7, %v753_v22  ;;  %v722_v7 = vmax.f32 %v584_v35, %v721_v51 }
  0xc1   : > { %v559_v8 = vmul.f32 0.01, %v488_v52  ;;  %vm527_vm3 = vcmp.gt.f32.partialorder %v488_v52, 0.0  ;;  %v687_v35 = vrot.slane %v1624_v59, 2 }
  0xc2   : > { %v568_v40 = vsel %vm504_vm9, %v419_v25, %v536_v31  ;;  %v1614_v25 = vpop.f32.mrf.mxu1  ;;  %v622_v31 = vmax.f32 %v620_v2, %v621_v13  ;;  %v838_v2 = vsel %vm837_vm14, %v606_v43, %v1607_v0  ;;  %v755_v3 = vrot.slane %v754_v45, 1 }
  0xc3   : > { %v625_v53 = vrot.slane %v568_v40, 4  ;;  %v840_v0 = vsel %vm839_vm2, %v612_v61, %v838_v2  ;;  %v591_v15 = vsel %vm527_vm3, %v488_v52, %v559_v8  ;;  %v723_v49 = vrot.slane %v722_v7, 2 }
  0xc4   : > { %v458_v27 = vadd.f32 %v1542_v41, %v1614_v25  ;;  %vm849_vm9 = vcmask 1047559   ;;  %v1649_v38 = vmax.f32 %v754_v45, %v755_v3  ;;  %v580_v25 = vsel %vm516_vm8, %v455_v11, %v548_v23 }
  0xc5   : > { %v421_v50 = vpop.f32.mrf.mxu0  ;;  %v626_v4 = vmax.f32 %v568_v40, %v625_v53  ;;  %v697_v45 = vrot.slane %v580_v25, 4 }
  0xc6   : > { %v422_v54 = vadd.f32 %v1542_v41, %v421_v50  ;;  %v623_v50 = vrot.slane %v622_v31, 1  ;;  %v549_v43 = vmul.f32 0.01, %v458_v27 }
  0xc7   : > { %v627_v18 = vrot.slane %v626_v4, 2 }
  0xc8   : > { %vm505_vm11 = vcmp.gt.f32.partialorder %v422_v54, 0.0  ;;  %v537_v63 = vmul.f32 0.01, %v422_v54  ;;  %v624_v6 = vmax.f32 %v622_v31, %v623_v50  ;;  %v763_v31 = vrot.slane %v591_v15, 4 }
  0xc9   : > { %v628_v36 = vmax.f32 %v626_v4, %v627_v18  ;;  %v692_v4 = vmax.f32 %v579_v32, %v691_v47  ;;  %v470_v18 = vadd.f32 %v1542_v41, %v1610_v19 }
  0xca   : > { %v569_v5 = vsel %vm505_vm11, %v422_v54, %v537_v63  ;;  %v764_v51 = vmax.f32 %v591_v15, %v763_v31  ;;  %vm517_vm11 = vcmp.gt.f32.partialorder %v458_v27, 0.0 }
  0xcb   : > { %v631_v9 = vrot.slane %v569_v5, 4  ;;  %v629_v60 = vrot.slane %v628_v36, 1  ;;  %vm521_vm10 = vcmp.gt.f32.partialorder %v470_v18, 0.0 }
  0xcc   : > { %v765_v15 = vrot.slane %v764_v51, 2 }
  0xcd   : > { %v632_v16 = vmax.f32 %v569_v5, %v631_v9  ;;  %v424_v17 = vpop.f32.mrf.mxu0  ;;  %v1628_v5 = vpop.f32.mrf.mxu2  ;;  %v630_v10 = vmax.f32 %v628_v36, %v629_v60  ;;  %v553_v36 = vmul.f32 0.01, %v470_v18 }
  0xce   : > { %v425_v20 = vadd.f32 %v1542_v41, %v424_v17  ;;  %v460_v9 = vpop.f32.mrf.mxu1  ;;  %v842_v17 = vsel %vm841_vm4, %v618_v56, %v840_v0 }
  0xcf   : > { %v633_v24 = vrot.slane %v632_v16, 2  ;;  %v844_v22 = vsel %vm843_vm5, %v624_v6, %v842_v17  ;;  %v461_v44 = vadd.f32 %v1542_v41, %v460_v9  ;;  %v585_v52 = vsel %vm521_vm10, %v470_v18, %v553_v36 }
  0xd0   : > { %vm506_vm1 = vcmp.gt.f32.partialorder %v425_v20, 0.0  ;;  %v538_v28 = vmul.f32 0.01, %v425_v20  ;;  %v846_v26 = vsel %vm845_vm6, %v630_v10, %v844_v22  ;;  %v727_v6 = vrot.slane %v585_v52, 4 }
  0xd1   : > { %v634_v40 = vmax.f32 %v632_v16, %v633_v24  ;;  %v693_v16 = vrot.slane %v692_v4, 2  ;;  %v490_v24 = vpop.f32.mrf.mxu3  ;;  %vm518_vm15 = vcmp.gt.f32.partialorder %v461_v44, 0.0 }
  0xd2   : > { %v570_v37 = vsel %vm506_vm1, %v425_v20, %v538_v28  ;;  %v491_v39 = vadd.f32 %v1542_v41, %v490_v24 }
  0xd3   : > { %v637_v42 = vrot.slane %v570_v37, 4  ;;  %v635_v55 = vrot.slane %v634_v40, 1  ;;  %v694_v19 = vmax.f32 %v692_v4, %v693_v16  ;;  %v698_v4 = vmax.f32 %v580_v25, %v697_v45 }
  0xd4   : > { %vm528_vm12 = vcmp.gt.f32.partialorder %v491_v39, 0.0 }
  0xd5   : > { %v638_v53 = vmax.f32 %v570_v37, %v637_v42  ;;  %v427_v54 = vpop.f32.mrf.mxu0  ;;  %v636_v13 = vmax.f32 %v634_v40, %v635_v55  ;;  %v475_v40 = vpop.f32.mrf.mxu2  ;;  %v1652_v42 = vmax.f32 %v722_v7, %v723_v49  ;;  %v695_v50 = vrot.slane %v694_v19, 1 }
  0xd6   : > { %v428_v29 = vadd.f32 %v1542_v41, %v427_v54  ;;  %v463_v47 = vpop.f32.mrf.mxu1  ;;  %v560_v55 = vmul.f32 0.01, %v491_v39  ;;  %v581_v54 = vsel %vm517_vm11, %v458_v27, %v549_v43  ;;  %v699_v18 = vrot.slane %v698_v4, 2 }
  0xd7   : > { %v639_v63 = vrot.slane %v638_v53, 2  ;;  %v848_v28 = vsel %vm847_vm7, %v636_v13, %v846_v26  ;;  %v464_v61 = vadd.f32 %v1542_v41, %v463_v47  ;;  %v703_v11 = vrot.slane %v581_v54, 4 }
  0xd8   : > { %v539_v2 = vmul.f32 0.01, %v428_v29  ;;  %vm507_vm0 = vcmp.gt.f32.partialorder %v428_v29, 0.0  ;;  %v725_v0 = vrot.slane %v1652_v42, 1  ;;  %v592_v16 = vsel %vm528_vm12, %v491_v39, %v560_v55 }
  0xd9   : > { %v640_v1 = vmax.f32 %v638_v53, %v639_v63  ;;  %v476_v53 = vadd.f32 %v1542_v41, %v475_v40  ;;  %v550_v63 = vmul.f32 0.01, %v461_v44  ;;  %v493_v56 = vpop.f32.mrf.mxu3  ;;  %v551_v9 = vmul.f32 0.01, %v464_v61 }
  0xda   : > { %v571_v13 = vsel %vm507_vm0, %v428_v29, %v539_v2  ;;  %vm519_vm8 = vcmp.gt.f32.partialorder %v464_v61, 0.0  ;;  %v1667_v26 = vmax.f32 %v585_v52, %v727_v6  ;;  %v769_v27 = vrot.slane %v592_v16, 4 }
  0xdb   : > { %v641_v14 = vrot.slane %v640_v1, 1  ;;  %v555_v7 = vmul.f32 0.01, %v476_v53  ;;  %vm523_vm3 = vcmp.gt.f32.partialorder %v476_v53, 0.0  ;;  %v582_v12 = vsel %vm518_vm15, %v461_v44, %v550_v63 }
  0xdc   : > { %v643_v49 = vrot.slane %v571_v13, 4  ;;  %v583_v23 = vsel %vm519_vm8, %v464_v61, %v551_v9  ;;  %v700_v40 = vmax.f32 %v698_v4, %v699_v18  ;;  %v494_v52 = vadd.f32 %v1542_v41, %v493_v56 }
  0xdd   : > { %v430_v20 = vpop.f32.mrf.mxu0  ;;  %v642_v21 = vmax.f32 %v640_v1, %v641_v14  ;;  %v473_v1 = vadd.f32 %v1542_v41, %v1628_v5  ;;  %v1662_v14 = vmax.f32 %v694_v19, %v695_v50  ;;  %v709_v5 = vrot.slane %v582_v12, 4 }
  0xde   : > { %v431_v37 = vadd.f32 %v1542_v41, %v430_v20  ;;  %v587_v20 = vsel %vm523_vm3, %v476_v53, %v555_v7  ;;  %v715_v25 = vrot.slane %v583_v23, 4  ;;  %v644_v44 = vmax.f32 %v571_v13, %v643_v49  ;;  %v932_v49 = vld [vmem:[%s1883_s3 + $0x78] sm:$0xff] }
  0xdf   : > { %v850_v32 = vsel %vm849_vm9, %v642_v21, %v848_v28  ;;  %v704_v28 = vmax.f32 %v581_v54, %v703_v11  ;;  %v554_v19 = vmul.f32 0.01, %v473_v1  ;;  %v739_v31 = vrot.slane %v587_v20, 4  ;;  %935 = vmatpush.msrb.mxu2 %v932_v49 }
  0xe0   : > { %892 = vmatmul.f32.vlgmr.msrb.gmra.mxu1 %v850_v32  ;;  %v540_v57 = vmul.f32 0.01, %v431_v37  ;;  %vm508_vm13 = vcmp.gt.f32.partialorder %v431_v37, 0.0  ;;  %vm522_vm11 = vcmp.gt.f32.partialorder %v473_v1, 0.0  ;;  %v710_v43 = vmax.f32 %v582_v12, %v709_v5 }
  0xe1   : > { %v496_v29 = vpop.f32.mrf.mxu3  ;;  %v1671_v50 = vmax.f32 %v592_v16, %v769_v27  ;;  %v705_v45 = vrot.slane %v704_v28, 2  ;;  %v740_v61 = vmax.f32 %v587_v20, %v739_v31  ;;  %v716_v55 = vmax.f32 %v583_v23, %v715_v25  ;;  %v931_v23 = vld [vmem:[%s1883_s3 + $0x70] sm:$0xff] }
  0xe2   : > { %v572_v8 = vsel %vm508_vm13, %v431_v37, %v540_v57  ;;  %v1669_v37 = vmax.f32 %v764_v51, %v765_v15  ;;  %v729_v57 = vrot.slane %v1667_v26, 2  ;;  %v711_v4 = vrot.slane %v710_v43, 2  ;;  %936 = vmatpush.msrb.mxu2 %v931_v23  ;;  %v925_v23 = vld [vmem:[%s1883_s3 + $0x40] sm:$0xff] }
  0xe3   : > { %v649_v17 = vrot.slane %v572_v8, 4  ;;  %v645_v6 = vrot.slane %v644_v44, 2  ;;  %v561_v56 = vmul.f32 0.01, %v494_v52  ;;  %v741_v11 = vrot.slane %v740_v61, 2 }
  0xe4   : > { %vm529_vm13 = vcmp.gt.f32.partialorder %v494_v52, 0.0  ;;  %v717_v16 = vrot.slane %v716_v55, 2  ;;  %v712_v15 = vmax.f32 %v710_v43, %v711_v4 }
  0xe5   : > { %v433_v60 = vpop.f32.mrf.mxu0  ;;  %v650_v32 = vmax.f32 %v572_v8, %v649_v17  ;;  %v706_v8 = vmax.f32 %v704_v28, %v705_v45  ;;  %v646_v18 = vmax.f32 %v644_v44, %v645_v6  ;;  %v593_v27 = vsel %vm529_vm13, %v494_v52, %v561_v56 }
  0xe6   : > { %v434_v62 = vadd.f32 %v1542_v41, %v433_v60  ;;  %v586_v60 = vsel %vm522_vm11, %v473_v1, %v554_v19  ;;  %v742_v28 = vmax.f32 %v740_v61, %v741_v11  ;;  %v713_v43 = vrot.slane %v712_v15, 1 }
  0xe7   : > { %v651_v51 = vrot.slane %v650_v32, 2  ;;  %v733_v9 = vrot.slane %v586_v60, 4  ;;  %v707_v5 = vrot.slane %v706_v8, 1  ;;  %v647_v44 = vrot.slane %v646_v18, 1 }
  0xe8   : > { %vm509_vm1 = vcmp.gt.f32.partialorder %v434_v62, 0.0  ;;  %v541_v3 = vmul.f32 0.01, %v434_v62  ;;  %v775_v52 = vrot.slane %v593_v27, 4  ;;  %v743_v61 = vrot.slane %v742_v28, 1 }
  0xe9   : > { %v652_v12 = vmax.f32 %v650_v32, %v651_v51  ;;  %v734_v31 = vmax.f32 %v586_v60, %v733_v9  ;;  %v718_v32 = vmax.f32 %v716_v55, %v717_v16  ;;  %v708_v45 = vmax.f32 %v706_v8, %v707_v5  ;;  %v929_v60 = vld [vmem:[%s1883_s3 + $0x60] sm:$0xff] }
  0xea   : > { %v573_v10 = vsel %vm509_vm1, %v434_v62, %v541_v3  ;;  %v497_v62 = vadd.f32 %v1542_v41, %v496_v29  ;;  %v701_v3 = vrot.slane %v700_v40, 1  ;;  %v688_v55 = vmax.f32 %v1624_v59, %v687_v35 }
  0xeb   : > { %v655_v21 = vrot.slane %v573_v10, 4  ;;  %v653_v19 = vrot.slane %v652_v12, 1  ;;  %v714_v4 = vmax.f32 %v712_v15, %v713_v43  ;;  %v648_v6 = vmax.f32 %v646_v18, %v647_v44  ;;  %v926_v15 = vld [vmem:[%s1883_s3 + $0x48] sm:$0xff]  ;;  %v923_v43 = vld [vmem:[%s1883_s3 + $0x30] sm:$0xff] }
  0xec   : > { %v562_v13 = vmul.f32 0.01, %v497_v62  ;;  %vm530_vm15 = vcmp.gt.f32.partialorder %v497_v62, 0.0  ;;  %v776_v8 = vmax.f32 %v593_v27, %v775_v52  ;;  %v683_v59 = vrot.slane %v1622_v58, 1 }
  0xed   : > { %v436_v22 = vpop.f32.mrf.mxu0  ;;  %v656_v39 = vmax.f32 %v573_v10, %v655_v21  ;;  %v654_v51 = vmax.f32 %v652_v12, %v653_v19  ;;  %v689_v11 = vrot.slane %v688_v55, 1  ;;  %v678_v18 = vmax.f32 %v1596_v33, %v677_v46 }
  0xee   : > { %v437_v24 = vadd.f32 %v1542_v41, %v436_v22  ;;  %v771_v22 = vrot.slane %v1671_v50, 2  ;;  %v594_v29 = vsel %vm530_vm15, %v497_v62, %v562_v13  ;;  %v684_v5 = vmax.f32 %v1622_v58, %v683_v59 }
  0xef   : > { %v657_v54 = vrot.slane %v656_v39, 2  ;;  %v851_v12 = vsel %vm837_vm14, %v654_v51, %v648_v6  ;;  %v726_v33 = vmax.f32 %v1652_v42, %v725_v0  ;;  %v767_v58 = vrot.slane %v1669_v37, 1  ;;  %v1286_v6 = vld [vmem:[%s1885_s5 + $0x1] ss:$0 sm:$0xff] }
  0xf0   : > { %vm510_vm10 = vcmp.gt.f32.partialorder %v437_v24, 0.0  ;;  %v542_v36 = vmul.f32 0.01, %v437_v24  ;;  %v772_v56 = vmax.f32 %v1671_v50, %v771_v22  ;;  %v777_v22 = vrot.slane %v776_v8, 2 }
  0xf1   : > { %v658_v17 = vmax.f32 %v656_v39, %v657_v54  ;;  %v930_v39 = vld [vmem:[%s1883_s3 + $0x68] sm:$0xff]  ;;  %v781_v54 = vrot.slane %v594_v29, 4 }
  0xf2   : > { %v574_v47 = vsel %vm510_vm10, %v437_v24, %v542_v36  ;;  %v702_v24 = vmax.f32 %v700_v40, %v701_v3  ;;  %v730_v40 = vmax.f32 %v1667_v26, %v729_v57  ;;  %937 = vmatpush.msrb.mxu2 %v930_v39  ;;  %v735_v3 = vrot.slane %v734_v31, 2 }
  0xf3   : > { %v661_v53 = vrot.slane %v574_v47, 4  ;;  %v659_v36 = vrot.slane %v658_v17, 1  ;;  %v773_v44 = vrot.slane %v772_v56, 1 }
  0xf4   : > { %v858_v62 = vsel %vm837_vm14, %v702_v24, %v1662_v14  ;;  %938 = vmatpush.msrb.mxu2 %v929_v60  ;;  %v927_v14 = vld [vmem:[%s1883_s3 + $0x50] sm:$0xff]  ;;  %v731_v49 = vrot.slane %v730_v40, 1  ;;  %v690_v24 = vmax.f32 %v688_v55, %v689_v11  ;;  %v987_v11 = vld [vmem:[%s1884_s4 + $0x58] sm:$0xff] }
  0xf5   : > { %v662_v63 = vmax.f32 %v574_v47, %v661_v53  ;;  %v439_v2 = vpop.f32.mrf.mxu0  ;;  %v660_v26 = vmax.f32 %v658_v17, %v659_v36  ;;  %v859_v35 = vsel %vm839_vm2, %v708_v45, %v858_v62  ;;  %v774_v60 = vmax.f32 %v772_v56, %v773_v44  ;;  %v989_v56 = vld [vmem:[%s1884_s4 + $0x68] sm:$0xff] }
  0xf6   : > { %v440_v7 = vadd.f32 %v1542_v41, %v439_v2  ;;  %v928_v2 = vld [vmem:[%s1883_s3 + $0x58] sm:$0xff] }
  0xf7   : > { %v663_v10 = vrot.slane %v662_v63, 2  ;;  %939 = vmatpush.msrb.mxu2 %v928_v2  ;;  %v852_v17 = vsel %vm839_vm2, %v660_v26, %v851_v12  ;;  %v919_v2 = vld [vmem:[%s1883_s3 + $0x10] sm:$0xff] }
  0xf8   : > { %vm511_vm12 = vcmp.gt.f32.partialorder %v440_v7, 0.0  ;;  %v543_v1 = vmul.f32 0.01, %v440_v7  ;;  %v986_v12 = vld [vmem:[%s1884_s4 + $0x50] sm:$0xff] }
  0xf9   : > { %v664_v20 = vmax.f32 %v662_v63, %v663_v10  ;;  %v719_v63 = vrot.slane %v718_v32, 1  ;;  %v744_v10 = vmax.f32 %v742_v28, %v743_v61  ;;  %940 = vmatpush.msrb.mxu2 %v927_v14  ;;  %v920_v61 = vld [vmem:[%s1883_s3 + $0x18] sm:$0xff]  ;;  %v990_v14 = vld [vmem:[%s1884_s4 + $0x70] sm:$0xff] }
  0xfa   : > { %v575_v21 = vsel %vm511_vm12, %v440_v7, %v543_v1  ;;  %v782_v1 = vmax.f32 %v594_v29, %v781_v54 }
  0xfb   : > { %v667_v41 = vrot.slane %v575_v21, 4  ;;  %v665_v47 = vrot.slane %v664_v20, 1  ;;  %v720_v13 = vmax.f32 %v718_v32, %v719_v63  ;;  %v865_v46 = vsel %vm837_vm14, %v1645_v34, %v744_v10  ;;  %941 = vmatpush.msrb.mxu2 %v926_v15  ;;  %v988_v10 = vld [vmem:[%s1884_s4 + $0x60] sm:$0xff] }
  0xfc   : > { %v762_v32 = vmax.f32 %v1641_v30, %v761_v48  ;;  %v783_v36 = vrot.slane %v782_v1, 2  ;;  %v778_v34 = vmax.f32 %v776_v8, %v777_v22  ;;  %v866_v39 = vsel %vm839_vm2, %v1649_v38, %v865_v46  ;;  %v922_v48 = vld [vmem:[%s1883_s3 + $0x28] sm:$0xff] }
  0xfd   : > { %v668_v25 = vmax.f32 %v575_v21, %v667_v41  ;;  %v666_v7 = vmax.f32 %v664_v20, %v665_v47  ;;  %v736_v20 = vmax.f32 %v734_v31, %v735_v3  ;;  %v860_v21 = vsel %vm841_vm4, %v714_v4, %v859_v35  ;;  %v924_v31 = vld [vmem:[%s1883_s3 + $0x38] sm:$0xff]  ;;  %942 = vmatpush.msrb.mxu2 %v925_v23  ;;  %v918_v3 = vld [vmem:[%s1883_s3 + $0x8] sm:$0xff]  ;;  %v917_v4 = vld [vmem:[%s1883_s3] sm:$0xff] }
  0xfe   : > { %v861_v19 = vsel %vm843_vm5, %v720_v13, %v860_v21  ;;  %v768_v30 = vmax.f32 %v1669_v37, %v767_v58  ;;  %v784_v45 = vmax.f32 %v782_v1, %v783_v36  ;;  %v779_v52 = vrot.slane %v778_v34, 1  ;;  %v991_v35 = vld [vmem:[%s1884_s4 + $0x78] sm:$0xff]  ;;  %v985_v13 = vld [vmem:[%s1884_s4 + $0x48] sm:$0xff] }
  0xff   : > { %v669_v53 = vrot.slane %v668_v25, 2  ;;  %v853_v50 = vsel %vm841_vm4, %v666_v7, %v852_v17  ;;  %v737_v0 = vrot.slane %v736_v20, 1  ;;  %v862_v29 = vsel %vm845_vm6, %v726_v33, %v861_v19  ;;  %943 = vmatpush.msrb.mxu2 %v924_v31  ;;  %994 = vmatpush.msrb.mxu3 %v991_v35  ;;  %v984_v17 = vld [vmem:[%s1884_s4 + $0x40] sm:$0xff]  ;;  %v981_v22 = vld [vmem:[%s1884_s4 + $0x28] sm:$0xff]  ;;  %v979_v23 = vld [vmem:[%s1884_s4 + $0x18] sm:$0xff] }
 0x100   : > { %v785_v55 = vrot.slane %v784_v45, 1  ;;  %v780_v62 = vmax.f32 %v778_v34, %v779_v52  ;;  %v977_v19 = vld [vmem:[%s1884_s4 + $0x8] sm:$0xff]  ;;  %v976_v31 = vld [vmem:[%s1884_s4] sm:$0xff] }
 0x101   : > { %v670_v57 = vmax.f32 %v668_v25, %v669_v53  ;;  %v732_v25 = vmax.f32 %v730_v40, %v731_v49  ;;  %v738_v47 = vmax.f32 %v736_v20, %v737_v0  ;;  %v867_v40 = vsel %vm841_vm4, %v762_v32, %v866_v39  ;;  %944 = vmatpush.msrb.mxu2 %v923_v43  ;;  %v921_v53 = vld [vmem:[%s1883_s3 + $0x20] sm:$0xff]  ;;  %v982_v20 = vld [vmem:[%s1884_s4 + $0x30] sm:$0xff] }
 0x102   : > { %v868_v37 = vsel %vm843_vm5, %v768_v30, %v867_v40  ;;  %v786_v63 = vmax.f32 %v784_v45, %v785_v55  ;;  %995 = vmatpush.msrb.mxu3 %v990_v14  ;;  %v1287_v32 = vld [vmem:[%s1885_s5 + $0x2] ss:$0 sm:$0xff] }
 0x103   : > { %v671_v9 = vrot.slane %v670_v57, 1  ;;  %v863_v38 = vsel %vm847_vm7, %v732_v25, %v862_v29  ;;  %945 = vmatpush.msrb.mxu2 %v922_v48  ;;  %v869_v54 = vsel %vm845_vm6, %v774_v60, %v868_v37 }
 0x104   : > { %v864_v51 = vsel %vm849_vm9, %v738_v47, %v863_v38  ;;  %v870_v26 = vsel %vm847_vm7, %v780_v62, %v869_v54  ;;  %996 = vmatpush.msrb.mxu3 %v989_v56 }
 0x105   : > { %v672_v16 = vmax.f32 %v670_v57, %v671_v9  ;;  %946 = vmatpush.msrb.mxu2 %v921_v53  ;;  %v871_v57 = vsel %vm849_vm9, %v786_v63, %v870_v26  ;;  %v1288_v53 = vld [vmem:[%s1885_s5 + $0x3] ss:$0 sm:$0xff] }
 0x106   : > { %997 = vmatpush.msrb.mxu3 %v988_v10 }
 0x107   : > { %v854_v41 = vsel %vm843_vm5, %v672_v16, %v853_v50  ;;  %947 = vmatpush.msrb.mxu2 %v920_v61 }
 0x108   : > { %v855_v27 = vsel %vm845_vm6, %v678_v18, %v854_v41  ;;  %998 = vmatpush.msrb.mxu3 %v987_v11  ;;  %v983_v18 = vld [vmem:[%s1884_s4 + $0x38] sm:$0xff]  ;;  %v980_v41 = vld [vmem:[%s1884_s4 + $0x20] sm:$0xff] }
 0x109   : > { %v856_v28 = vsel %vm847_vm7, %v684_v5, %v855_v27  ;;  %948 = vmatpush.msrb.mxu2 %v919_v2 }
 0x10a   : > { %v857_v42 = vsel %vm849_vm9, %v690_v24, %v856_v28  ;;  %999 = vmatpush.msrb.mxu3 %v986_v12  ;;  %v978_v28 = vld [vmem:[%s1884_s4 + $0x10] sm:$0xff] }
 0x10b   : > { %895 = vmatmul.f32.gmra.mxu1 %v857_v42  ;;  %949 = vmatpush.msrb.mxu2 %v918_v3 }
 0x10c   : > { %1000 = vmatpush.msrb.mxu3 %v985_v13 }
 0x10d   : > { %950 = vmatpush.msrb.mxu2 %v917_v4 }
 0x10e   : > { %1001 = vmatpush.msrb.mxu3 %v984_v17 }
 0x110   : > { %1002 = vmatpush.msrb.mxu3 %v983_v18 }
 0x112   : > { %1003 = vmatpush.msrb.mxu3 %v982_v20 }
 0x113   : > { %898 = vmatmul.f32.gmra.mxu1 %v864_v51 }
 0x114   : > { %1004 = vmatpush.msrb.mxu3 %v981_v22 }
 0x116   : > { %1005 = vmatpush.msrb.mxu3 %v980_v41 }
 0x118   : > { %1006 = vmatpush.msrb.mxu3 %v979_v23 }
 0x11a   : > { %1007 = vmatpush.msrb.mxu3 %v978_v28 }
 0x11b   : > { %901 = vmatmul.f32.gmra.mxu1 %v871_v57 }
 0x11c   : > { %1008 = vmatpush.msrb.mxu3 %v977_v19 }
 0x11e   : > { %1009 = vmatpush.msrb.mxu3 %v976_v31 }
 0x15d   : > { %v893_v7 = vpop.f32.mrf.mxu1 }
 0x15e   : > { %v894_v8 = vadd.f32 %v1286_v6, %v893_v7 }
 0x160   : > { %v909_v9 = vmul.f32 0.01, %v894_v8  ;;  %vm905_vm14 = vcmp.gt.f32.partialorder %v894_v8, 0.0 }
 0x162   : > { %v913_v59 = vsel %vm905_vm14, %v894_v8, %v909_v9 }
 0x163   : > { %951 = vmatmul.f32.vlgmr.msrb.gmra.mxu2 %v913_v59 }
 0x188   : > { %v896_v1 = vpop.f32.mrf.mxu1 }
 0x189   : > { %v897_v16 = vadd.f32 %v1286_v6, %v896_v1 }
 0x18b   : > { %vm906_vm2 = vcmp.gt.f32.partialorder %v897_v16, 0.0  ;;  %v910_v15 = vmul.f32 0.01, %v897_v16 }
 0x18d   : > { %v914_v50 = vsel %vm906_vm2, %v897_v16, %v910_v15 }
 0x18e   : > { %954 = vmatmul.f32.gmra.mxu2 %v914_v50 }
 0x190   : > { %v899_v21 = vpop.f32.mrf.mxu1 }
 0x191   : > { %v900_v5 = vadd.f32 %v1286_v6, %v899_v21 }
 0x193   : > { %vm907_vm4 = vcmp.gt.f32.partialorder %v900_v5, 0.0  ;;  %v911_v49 = vmul.f32 0.01, %v900_v5 }
 0x195   : > { %v915_v24 = vsel %vm907_vm4, %v900_v5, %v911_v49 }
 0x196   : > { %957 = vmatmul.f32.gmra.mxu2 %v915_v24 }
 0x198   : > { %v902_v27 = vpop.f32.mrf.mxu1 }
 0x199   : > { %v903_v33 = vadd.f32 %v1286_v6, %v902_v27 }
 0x19b   : > { %vm908_vm5 = vcmp.gt.f32.partialorder %v903_v33, 0.0  ;;  %v912_v46 = vmul.f32 0.01, %v903_v33 }
 0x19d   : > { %v916_v58 = vsel %vm908_vm5, %v903_v33, %v912_v46 }
 0x19e   : > { %960 = vmatmul.f32.gmra.mxu2 %v916_v58 }
 0x1e6   : > { %v952_v36 = vpop.f32.mrf.mxu2 }
 0x1e7   : > { %v953_v42 = vadd.f32 %v1287_v32, %v952_v36 }
 0x1e9   : > { %v968_v0 = vmul.f32 0.01, %v953_v42  ;;  %vm964_vm6 = vcmp.gt.f32.partialorder %v953_v42, 0.0 }
 0x1eb   : > { %v972_v34 = vsel %vm964_vm6, %v953_v42, %v968_v0 }
 0x1ec   : > { %1010 = vmatmul.f32.vlgmr.msrb.gmra.mxu3 %v972_v34 }
 0x211   : > { %v955_v25 = vpop.f32.mrf.mxu2 }
 0x212   : > { %v956_v39 = vadd.f32 %v1287_v32, %v955_v25 }
 0x214   : > { %vm965_vm7 = vcmp.gt.f32.partialorder %v956_v39, 0.0  ;;  %v969_v43 = vmul.f32 0.01, %v956_v39 }
 0x216   : > { %v973_v44 = vsel %vm965_vm7, %v956_v39, %v969_v43 }
 0x217   : > { %1013 = vmatmul.f32.gmra.mxu3 %v973_v44 }
 0x219   : > { %v958_v29 = vpop.f32.mrf.mxu2 }
 0x21a   : > { %v959_v30 = vadd.f32 %v1287_v32, %v958_v29 }
 0x21c   : > { %vm966_vm9 = vcmp.gt.f32.partialorder %v959_v30, 0.0  ;;  %v970_v48 = vmul.f32 0.01, %v959_v30 }
 0x21e   : > { %v974_v47 = vsel %vm966_vm9, %v959_v30, %v970_v48 }
 0x21f   : > { %1016 = vmatmul.f32.gmra.mxu3 %v974_v47 }
 0x221   : > { %v961_v45 = vpop.f32.mrf.mxu2 }
 0x222   : > { %v962_v40 = vadd.f32 %v1287_v32, %v961_v45 }
 0x224   : > { %vm967_vm0 = vcmp.gt.f32.partialorder %v962_v40, 0.0  ;;  %v971_v38 = vmul.f32 0.01, %v962_v40 }
 0x226   : > { %v975_v52 = vsel %vm967_vm0, %v962_v40, %v971_v38 }
 0x227   : > { %1019 = vmatmul.f32.gmra.mxu3 %v975_v52 }
 0x26f   : > { %v1011_v60 = vpop.f32.mrf.mxu3 }
 0x270   : > { %v1012_v37 = vadd.f32 %v1288_v53, %v1011_v60 }
 0x272   : > { %1023 = vmax.xlane.f32.xlu0 %v1012_v37 }
 0x29a   : > { %v1014_v61 = vpop.f32.mrf.mxu3 }
 0x29b   : > { %v1015_v51 = vadd.f32 %v1288_v53, %v1014_v61 }
 0x29d   : > { %1025 = vmax.xlane.f32.xlu0 %v1015_v51 }
 0x2a2   : > { %v1017_v55 = vpop.f32.mrf.mxu3 }
 0x2a3   : > { %v1018_v62 = vadd.f32 %v1288_v53, %v1017_v55 }
 0x2a5   : > { %1027 = vmax.xlane.f32.xlu1 %v1018_v62 }
 0x2aa   : > { %v1020_v54 = vpop.f32.mrf.mxu3 }
 0x2ab   : > { %v1021_v63 = vadd.f32 %v1288_v53, %v1020_v54 }
 0x2ad   : > { %1029 = vmax.xlane.f32.xlu1 %v1021_v63 }
 0x2e5   : > { %v1024_v26 = vpop.xlane.xlu0 %1023 }
 0x2e6   : > { %v1031_v57 = vsub.f32 %v1012_v37, %v1024_v26 }
 0x2e8   : > { %v1035_v2 = vmul.f32 1.442695, %v1031_v57 }
 0x2ea   : > { %1289 = vpow2.f32 %v1035_v2 }
 0x2f0   : > { %v1290_v3 = vpop.eup %1289 }
 0x2f1   : > { %1043 = vadd.xlane.f32.xlu2 %v1290_v3 }
 0x310   : > { %v1026_v4 = vpop.xlane.xlu0 %1025 }
 0x311   : > { %v1032_v6 = vsub.f32 %v1015_v51, %v1026_v4 }
 0x313   : > { %v1037_v7 = vmul.f32 1.442695, %v1032_v6 }
 0x315   : > { %1291 = vpow2.f32 %v1037_v7 }
 0x318   : > { %v1028_v8 = vpop.xlane.xlu1 %1027 }
 0x319   : > { %v1033_v9 = vsub.f32 %v1018_v62, %v1028_v8 }
 0x31b   : > { %v1292_v59 = vpop.eup %1291  ;;  %v1039_v35 = vmul.f32 1.442695, %v1033_v9 }
 0x31c   : > { %1045 = vadd.xlane.f32.xlu2 %v1292_v59 }
 0x31d   : > { %1293 = vpow2.f32 %v1039_v35 }
 0x320   : > { %v1030_v14 = vpop.xlane.xlu1 %1029 }
 0x321   : > { %v1034_v56 = vsub.f32 %v1021_v63, %v1030_v14 }
 0x323   : > { %v1826_v10 = vpop.eup %1293  ;;  %v1041_v11 = vmul.f32 1.442695, %v1034_v56 }
 0x324   : > { %1047 = vadd.xlane.f32.xlu0 %v1826_v10 }
 0x325   : > { %1295 = vpow2.f32 %v1041_v11 }
 0x32b   : > { %v1829_v12 = vpop.eup %1295 }
 0x32c   : > { %1049 = vadd.xlane.f32.xlu1 %v1829_v12 }
 0x364   : > { %v1044_v1 = vpop.xlane.xlu2 %1043 }
 0x365   : > { %1297 = vrcp.f32 %v1044_v1  ;;  %v1062_v15 = vand.u32 2147483648, %v1044_v1  ;;  %v1060_v50 = vand.u32 2147483647, %v1044_v1  ;;  %vm1056_vm3 = vweird.f32 %v1044_v1 }
 0x367   : > { %v1063_v21 = vor.u32 1.1754944e-38, %v1062_v15  ;;  %vm1061_vm10 = vcmp.eq.f32.partialorder %v1060_v50, 8.507059e+37 }
 0x36b   : > { %v1298_v13 = vpop.eup %1297 }
 0x36c   : > { %v1052_v16 = vmul.f32 %v1298_v13, %v1044_v1  ;;  %vm1057_vm1 = vweird.f32 %v1298_v13 }
 0x36d   : > { %vm1058_vm8 = vmor %vm1056_vm3, %vm1057_vm1 }
 0x36e   : > { %v1053_v17 = vsub.f32 1.0, %v1052_v16 }
 0x370   : > { %v1054_v18 = vmul.f32 %v1298_v13, %v1053_v17 }
 0x372   : > { %v1055_v20 = vadd.f32 %v1298_v13, %v1054_v18 }
 0x374   : > { %v1059_v22 = vsel %vm1058_vm8, %v1298_v13, %v1055_v20 }
 0x375   : > { %v1064_v5 = vsel %vm1061_vm10, %v1063_v21, %v1059_v22 }
 0x376   : > { %v1107_v41 = vmul.f32 %v1290_v3, %v1064_v5 }
 0x378   : > { %1111 = vst [vmem:[%s1835_s20] sm:$0xff] %v1107_v41 }
 0x38f   : > { %v1046_v49 = vpop.xlane.xlu2 %1045 }
 0x390   : > { %1299 = vrcp.f32 %v1046_v49  ;;  %v1076_v46 = vand.u32 2147483648, %v1046_v49  ;;  %v1074_v28 = vand.u32 2147483647, %v1046_v49  ;;  %vm1070_vm12 = vweird.f32 %v1046_v49 }
 0x392   : > { %v1077_v32 = vor.u32 1.1754944e-38, %v1076_v46  ;;  %vm1075_vm15 = vcmp.eq.f32.partialorder %v1074_v28, 8.507059e+37 }
 0x396   : > { %v1300_v23 = vpop.eup %1299 }
 0x397   : > { %v1066_v24 = vmul.f32 %v1300_v23, %v1046_v49  ;;  %v1048_v27 = vpop.xlane.xlu0 %1047  ;;  %vm1071_vm11 = vweird.f32 %v1300_v23 }
 0x398   : > { %1301 = vrcp.f32 %v1048_v27  ;;  %vm1072_vm13 = vmor %vm1070_vm12, %vm1071_vm11  ;;  %v1090_v43 = vand.u32 2147483648, %v1048_v27  ;;  %v1088_v29 = vand.u32 2147483647, %v1048_v27  ;;  %vm1084_vm2 = vweird.f32 %v1048_v27 }
 0x399   : > { %v1067_v33 = vsub.f32 1.0, %v1066_v24 }
 0x39a   : > { %v1091_v47 = vor.u32 1.1754944e-38, %v1090_v43  ;;  %vm1089_vm5 = vcmp.eq.f32.partialorder %v1088_v29, 8.507059e+37 }
 0x39b   : > { %v1068_v58 = vmul.f32 %v1300_v23, %v1067_v33 }
 0x39d   : > { %v1069_v19 = vadd.f32 %v1300_v23, %v1068_v58 }
 0x39e   : > { %v1302_v31 = vpop.eup %1301 }
 0x39f   : > { %v1073_v36 = vsel %vm1072_vm13, %v1300_v23, %v1069_v19  ;;  %v1080_v42 = vmul.f32 %v1302_v31, %v1048_v27  ;;  %v1050_v0 = vpop.xlane.xlu1 %1049  ;;  %vm1085_vm14 = vweird.f32 %v1302_v31 }
 0x3a0   : > { %v1078_v34 = vsel %vm1075_vm15, %v1077_v32, %v1073_v36  ;;  %1303 = vrcp.f32 %v1050_v0  ;;  %vm1086_vm4 = vmor %vm1084_vm2, %vm1085_vm14  ;;  %v1104_v60 = vand.u32 2147483648, %v1050_v0  ;;  %v1102_v61 = vand.u32 2147483647, %v1050_v0 }
 0x3a1   : > { %v1108_v25 = vmul.f32 %v1292_v59, %v1078_v34  ;;  %v1081_v39 = vsub.f32 1.0, %v1080_v42  ;;  %vm1098_vm7 = vweird.f32 %v1050_v0 }
 0x3a2   : > { %v1105_v55 = vor.u32 1.1754944e-38, %v1104_v60  ;;  %vm1103_vm0 = vcmp.eq.f32.partialorder %v1102_v61, 8.507059e+37 }
 0x3a3   : > { %1112 = vst [vmem:[%s1835_s20 + $0x8] sm:$0xff] %v1108_v25  ;;  %v1082_v44 = vmul.f32 %v1302_v31, %v1081_v39 }
 0x3a5   : > { %v1083_v30 = vadd.f32 %v1302_v31, %v1082_v44 }
 0x3a6   : > { %v1304_v48 = vpop.eup %1303 }
 0x3a7   : > { %v1087_v45 = vsel %vm1086_vm4, %v1302_v31, %v1083_v30  ;;  %v1094_v40 = vmul.f32 %v1304_v48, %v1050_v0  ;;  %vm1099_vm6 = vweird.f32 %v1304_v48 }
 0x3a8   : > { %v1092_v38 = vsel %vm1089_vm5, %v1091_v47, %v1087_v45  ;;  %vm1100_vm9 = vmor %vm1098_vm7, %vm1099_vm6 }
 0x3a9   : > { %v1109_v52 = vmul.f32 %v1826_v10, %v1092_v38  ;;  %v1095_v53 = vsub.f32 1.0, %v1094_v40 }
 0x3ab   : > { %1113 = vst [vmem:[%s1835_s20 + $0x10] sm:$0xff] %v1109_v52  ;;  %v1096_v37 = vmul.f32 %v1304_v48, %v1095_v53 }
 0x3ad   : > { %v1097_v51 = vadd.f32 %v1304_v48, %v1096_v37 }
 0x3af   : > { %v1101_v62 = vsel %vm1100_vm9, %v1304_v48, %v1097_v51 }
 0x3b0   : > { %v1106_v54 = vsel %vm1103_vm0, %v1105_v55, %v1101_v62 }
 0x3b1   : > { %v1110_v63 = vmul.f32 %v1829_v12, %v1106_v54 }
 0x3b3   : > { %1114 = vst [vmem:[%s1835_s20 + $0x18] sm:$0xff] %v1110_v63 }
 0x3b4   : > { %1332 = shalt.err (!%p1329_p3)
}
 0x3b5   : > { %s1369_s18 = smov 128   ;;  %s1370_s19 = smov 8  }
 0x3b6   : > { %1244 = dma.vmem_to_hbm [thread:$0]  (%p1441_p5), %s1129_s29, 512, %s1131_s9, %s1116_s13, %s1369_s18, %s1369_s18, %s1370_s19  }
 0x3b7 PF: > { %p1250_p4 = scmp.ge.s32.totalorder %s1367_s24, 2  ;;  %s1145_s20 = sand.u32 1, %s1355_s21  }
 0x3b8   : > { %s1146_s25 = scalar_lea.sflag [#allocation3], %s1145_s20 }
 0x3b9   : > { %p1247_p7 = pnand %p1250_p4, %p1445_p6 }
 0x3bb   : > { %p1248_p8 = pneg %p1247_p7 }
 0x3bd   : > { %1350 = dma.done.wait (%p1248_p8), %s1146_s25, 512  }
 0x3be   : > { %1352 = vsyncadd (%p1248_p8), %s1146_s25, 4294966784  ;;  %p16_p9 = scmp.ge.s32.totalorder %s1429_s27, 10   ;;  %s1889_s21 = smov %s1359_s22 }
 0x3bf   : > { %s1890_s22 = smov %s1363_s23  ;;  %s1891_s23 = smov %s1439_s30 }
 0x3c0   : > { %s1892_s24 = smov %s1429_s27  ;;  %18 = sbr.rel (!%p16_p9) target bundleno = 3 (0x3), region = 79 }
 0x3c5   :  { %1152 = vsyncpa [#allocation3], 1 }
 0x3c6   :  { %1154 = vsyncpa [#allocation3 + $0x1], 1 }

</bundles_post_ra>
